<compile_context>
chip_gen: v7x
topology: tpu7x:2x2x1
jax: 0.10.0
libtpu: 0.0.40
codegen_flags: <defaults>
</compile_context>

<pallas_src>
import functools

import jax
import jax.numpy as jnp
from jax import lax
from jax.experimental import pallas as pl
from jax.experimental.pallas import tpu as pltpu

LANE = 128
SUBLANE = 8


def _round_up(n, m):
    return ((n + m - 1) // m) * m


def softmax_regression_kernel(x_ref, w_ref, o_ref, *, n_out):
    # x_ref: (TB, n_in)   w_ref: (n_out_pad, n_in)   o_ref: (TB, n_out_pad)
    # logits = x @ W.T  (contract last axes of both operands -> no transpose copy)
    logits = lax.dot_general(
        x_ref[...],
        w_ref[...],
        dimension_numbers=(((1,), (1,)), ((), ())),
        preferred_element_type=jnp.float32,
    )
    # Columns >= n_out come from zero-padded weight rows; mask to -inf so they
    # contribute nothing to the max / log-sum-exp.
    col = lax.broadcasted_iota(jnp.int32, logits.shape, 1)
    logits = jnp.where(col < n_out, logits, jnp.float32(-jnp.inf))

    # Numerically stable log_softmax over dim=1.
    m = jnp.max(logits, axis=1, keepdims=True)
    shifted = logits - m
    lse = jnp.log(jnp.sum(jnp.exp(shifted), axis=1, keepdims=True))
    o_ref[...] = (shifted - lse).astype(o_ref.dtype)


def prepare_weight(weight):
    """One-time parameter prep (call at load time, NOT per forward call).

    weight: [n_out, n_in] (PyTorch nn.Linear layout). Keeps that layout (the
    kernel contracts on the last axes so no HBM transpose is ever written) and
    zero-pads n_out up to a multiple of 128 so the MXU output / vector stores
    are lane-dense.
    """
    n_out, n_in = weight.shape
    n_out_pad = _round_up(max(n_out, LANE), LANE)
    return jnp.pad(weight.astype(jnp.float32), ((0, n_out_pad - n_out), (0, 0)))


def softmax_regression(x, weight_padded, n_out, *, tb=256,
                       vmem_budget_bytes=48 * 1024 * 1024):
    """x: [B, n_in] f32; weight_padded: [n_out_pad, n_in] from prepare_weight."""
    B, n_in = x.shape
    n_out_pad = weight_padded.shape[0]

    # Batch tile: multiple of 8 sublanes, no larger than the (padded) batch,
    # shrunk until the double-buffered working set fits the v7x-safe budget.
    tb = _round_up(min(tb, _round_up(B, SUBLANE)), SUBLANE)

    def working_set_bytes(t):
        # 2x double-buffered x and out tiles + (conservatively 2x) resident weight.
        return 4 * (2 * t * n_in + 2 * t * n_out_pad + 2 * n_out_pad * n_in)

    while tb > SUBLANE and working_set_bytes(tb) > vmem_budget_bytes:
        tb = _round_up(tb // 2, SUBLANE)

    B_pad = _round_up(B, tb)
    if B_pad != B:
        x = jnp.pad(x, ((0, B_pad - B), (0, 0)))

    grid = (B_pad // tb,)

    out = pl.pallas_call(
        functools.partial(softmax_regression_kernel, n_out=n_out),
        out_shape=jax.ShapeDtypeStruct((B_pad, n_out_pad), jnp.float32),
        grid_spec=pltpu.PrefetchScalarGridSpec(
            num_scalar_prefetch=0,
            grid=grid,
            in_specs=[
                # Batch-tiled x: DMA of tile i+1 overlaps compute of tile i.
                pl.BlockSpec((tb, n_in), lambda i: (i, 0)),
                # Weight stays VMEM-resident across all grid steps.
                pl.BlockSpec((n_out_pad, n_in), lambda i: (0, 0)),
            ],
            out_specs=pl.BlockSpec((tb, n_out_pad), lambda i: (i, 0)),
        ),
        compiler_params=pltpu.CompilerParams(
            # Batch tiles are independent -> shard across TensorCores on v7x.
            dimension_semantics=("parallel",),
            vmem_limit_bytes=vmem_budget_bytes,
        ),
    )(x, weight_padded)

    # Drop batch padding and the lane-padded logit columns.
    return out[:B, :n_out]


def reference(x, weight):
    return jax.nn.log_softmax(x @ weight.T, axis=1)


if __name__ == "__main__":
    key = jax.random.PRNGKey(0)
    kx, kw = jax.random.split(key)

    B, n_in, n_out = 16, 32, 16
    x = jax.random.normal(kx, (B, n_in), dtype=jnp.float32)
    # Deterministic "Kaiming-uniform-like" init for nn.Linear weight [n_out, n_in].
    bound = 1.0 / jnp.sqrt(jnp.float32(n_in))
    weight = jax.random.uniform(kw, (n_out, n_in), dtype=jnp.float32,
                                minval=-bound, maxval=bound)

    w_prepared = prepare_weight(weight)          # one-time param prep
    out = softmax_regression(x, w_prepared, n_out, tb=8)  # tb=8 -> grid=(2,)
    out = jax.block_until_ready(out)

    ref = reference(x, weight)
    assert out.shape == (B, n_out)
    assert jnp.allclose(out, ref, atol=1e-5, rtol=1e-5), "mismatch vs reference"

    print("KERNEL_OK")
</pallas_src>

<mosaic_0001>
module attributes {stable_mosaic.version = 11 : i64} {
  func.func @softmax_regression_kernel(%arg0: i32, %arg1: memref<8x32xf32, #tpu.memory_space<vmem>>, %arg2: memref<128x32xf32, #tpu.memory_space<vmem>>, %arg3: memref<8x128xf32, #tpu.memory_space<vmem>>) attributes {dimension_semantics = [#tpu.dimension_semantics<parallel>], iteration_bounds = array<i64: 2>, scalar_prefetch = 0 : i64, scratch_operands = 0 : i64, tpu.core_type = #tpu.core_type<tc>, window_params = [{transform_indices = @transform_0, window_bounds = array<i64: 8, 32>}, {pipeline_mode = #tpu.pipeline_mode<synchronous>, transform_indices = @transform_1, window_bounds = array<i64: 128, 32>}, {transform_indices = @transform_2, window_bounds = array<i64: 8, 128>}]} {
    %c0 = arith.constant 0 : index
    %c0_0 = arith.constant 0 : index
    %0 = vector.load %arg1[%c0, %c0_0] : memref<8x32xf32, #tpu.memory_space<vmem>>, vector<8x32xf32>
    %c0_1 = arith.constant 0 : index
    %c0_2 = arith.constant 0 : index
    %1 = vector.load %arg2[%c0_1, %c0_2] : memref<128x32xf32, #tpu.memory_space<vmem>>, vector<128x32xf32>
    %cst = arith.constant dense<0.000000e+00> : vector<8x128xf32>
    %2 = tpu.matmul %0, %1, %cst {dimension_numbers = #tpu.dot_dimension_numbers<[1], [1], [0], [0], [0, 0, 1, 0], [], []>} : vector<8x32xf32>, vector<128x32xf32>, vector<8x128xf32> -> vector<8x128xf32>
    %3 = tpu.iota {dimensions = array<i32: 1>} : vector<8x128xi32>
    %c16_i32 = arith.constant 16 : i32
    %4 = vector.broadcast %c16_i32 : i32 to vector<8x128xi32>
    %5 = arith.cmpi slt, %3, %4 : vector<8x128xi32>
    %cst_3 = arith.constant 0xFF800000 : f32
    %6 = vector.broadcast %cst_3 : f32 to vector<8x128xf32>
    %7 = arith.select %5, %2, %6 : vector<8x128xi1>, vector<8x128xf32>
    %cst_4 = arith.constant dense<0xFF800000> : vector<8xf32>
    %8 = vector.multi_reduction <maximumf>, %7, %cst_4 [1] : vector<8x128xf32> to vector<8xf32>
    %9 = vector.shape_cast %8 : vector<8xf32> to vector<8x1xf32>
    %10 = vector.broadcast %9 : vector<8x1xf32> to vector<8x128xf32>
    %11 = arith.subf %7, %10 : vector<8x128xf32>
    %12 = math.exp %11 : vector<8x128xf32>
    %cst_5 = arith.constant dense<0.000000e+00> : vector<8xf32>
    %13 = vector.multi_reduction <add>, %12, %cst_5 [1] : vector<8x128xf32> to vector<8xf32>
    %14 = vector.shape_cast %13 : vector<8xf32> to vector<8x1xf32>
    %15 = math.log %14 : vector<8x1xf32>
    %16 = vector.broadcast %15 : vector<8x1xf32> to vector<8x128xf32>
    %17 = arith.subf %11, %16 : vector<8x128xf32>
    %c0_6 = arith.constant 0 : index
    %c0_7 = arith.constant 0 : index
    %18 = vector.load %arg3[%c0_6, %c0_7] : memref<8x128xf32, #tpu.memory_space<vmem>>, vector<8x128xf32>
    tpu.vector_store %arg3[%c0_6, %c0_7], %17 {strides = array<i32>} : memref<8x128xf32, #tpu.memory_space<vmem>>, vector<8x128xf32>,
    return
  }
  func.func @transform_0(%arg0: i32) -> (i32, i32) {
    %c0_i32 = arith.constant 0 : i32
    %c0_i32_0 = arith.constant 0 : i32
    return %arg0, %c0_i32 : i32, i32
  }
  func.func @transform_1(%arg0: i32) -> (i32, i32) {
    %c0_i32 = arith.constant 0 : i32
    %c0_i32_0 = arith.constant 0 : i32
    %c0_i32_1 = arith.constant 0 : i32
    return %c0_i32, %c0_i32_0 : i32, i32
  }
  func.func @transform_2(%arg0: i32) -> (i32, i32) {
    %c0_i32 = arith.constant 0 : i32
    %c0_i32_0 = arith.constant 0 : i32
    return %arg0, %c0_i32 : i32, i32
  }
}

</mosaic_0001>

<bundles_post_ra>
// kernel: tpu_custom_call.1
= control target key start
LH: loop header
LB: loop body
LE: loop exit
PB: predicated region body
PF: predicated region fallthrough
CT: control target
= control target key end

     0   :  { %7 = vsyncpa [#allocation3], 0  ;;  %s777_s0 = inlined_call_operand.vmem [shape: f32[16,32], index: 0, kind: input, shape index: {}]   ;;  %s778_s1 = inlined_call_operand.vmem [shape: f32[128,32], index: 1, kind: input, shape index: {}]   ;;  %s779_s2 = inlined_call_operand.hbm [shape: f32[16,128], index: 2, kind: output, shape index: {}]  }
   0x1   :  { %9 = vsyncpa [#allocation3 + $0x1], 0  ;;  %s606_s9 = smov 0   ;;  %s608_s10 = smov 0  }
   0x2   :  { %s610_s11 = smov 0   ;;  %s612_s12 = smov 0  }
   0x3 LB: > { %s627_s13 = sadd.s32 4294967295, %s585_s12   ;;  %s366_s14 = sadd.s32 4294967294, %s585_s12   ;;  %s585_s12 = sphi %s612_s12, %s787_s12   ;;  %s581_s11 = sphi %s610_s11, %s786_s11   ;;  %s577_s10 = sphi %s608_s10, %s785_s10   ;;  %s573_s9 = sphi %s606_s9, %s784_s9  }
   0x4   : > { %s631_s15 = sadd.s32 1, %s585_s12   ;;  %s69_s16 = sadd.s32 1, %s581_s11 }
   0x5   : > { %s66_s17 = ssub.s32 %s585_s12, %s631_s15  ;;  %p79_p0 = scmp.ne.s32.totalorder %s581_s11, %s577_s10 }
   0x6   : > { %p67_p1 = scmp.eq.s32.totalorder %s66_s17, 0  ;;  %p80_p2 = scmp.eq.s32.totalorder %s627_s13, 1 }
   0x7   : > { %p85_p3 = scmp.ne.s32.totalorder %s577_s10, %s573_s9  ;;  %p86_p4 = scmp.eq.s32.totalorder %s366_s14, 1 }
   0x8   : > { %s642_s18 = scalar_select %p67_p1, %s581_s11, %s69_s16  }
   0x9   : > { %p644_p5 = por %p80_p2, %p79_p0  ;;  %p648_p6 = por %p86_p4, %p85_p3 }
   0xa   : > { %p369_p7 = scmp.ge.s32.totalorder %s585_s12, 1  ;;  %p114_p8 = scmp.lt.s32.totalorder %s585_s12, 3 }
   0xc   : > { %p115_p9 = pnand %p369_p7, %p114_p8 }
   0xd   : > { %v140_v0 = vld [vmem:[%s778_s1] sm:$0xff] (!%p115_p9)  ;;  %v141_v1 = vld [vmem:[%s778_s1 + $0x8] sm:$0xff] (!%p115_p9)  ;;  %vm156_vm0 = vcmask (!%p115_p9), 261120   ;;  %v587_v2 = vmov (!%p115_p9), 0.0|0.0   ;;  %vm588_vm2 = vmmov (!%p115_p9), 0   ;;  %v589_v5 = vmov (!%p115_p9), 0.0  }
   0xe   : > { %118 = sbr.rel (%p115_p9) target bundleno = 620 (0x26c), region = 28  ;;  %445 = vmatprep.subr.bf16.mxu0 (!%p115_p9), %v587_v2  ;;  %v446_v3 = vpack.c.bf16 (!%p115_p9), %v141_v1, %v140_v0  ;;  %vm662_vm1 = vmpackc.low (!%p115_p9), %vm156_vm0, %vm156_vm0  ;;  %442 = vmatprep.mubr.msk.f32.mxu0 (!%p115_p9), %vm588_vm2, %v589_v5  ;;  %v142_v6 = vld [vmem:[%s778_s1 + $0x10] sm:$0xff] (!%p115_p9)  ;;  %v143_v7 = vld [vmem:[%s778_s1 + $0x18] sm:$0xff] (!%p115_p9)  ;;  %p135_p10 = scmp.lt.s32.totalorder (!%p115_p9), %s627_s13, 1  ;;  %v278_v28 = vlaneseq (!%p115_p9) }
   0xf   : > { %v450_v8 = vpack.c.bf16 (!%p115_p9), %v143_v7, %v142_v6  ;;  %v144_v9 = vld [vmem:[%s778_s1 + $0x20] sm:$0xff] (!%p115_p9)  ;;  %v145_v10 = vld [vmem:[%s778_s1 + $0x28] sm:$0xff] (!%p115_p9)  ;;  %v146_v12 = vld [vmem:[%s778_s1 + $0x30] sm:$0xff] (!%p115_p9)  ;;  %s132_s17 = sand.u32 (!%p115_p9), 1, %s577_s10   ;;  %s390_s22 = sshll.u32 (!%p115_p9), %s627_s13, 7 }
  0x10   : > { %448 = vmatpush3.bf16.xpose.msk.msra.mxu0 (!%p115_p9), %vm662_vm1, %v446_v3  ;;  %v454_v11 = vpack.c.bf16 (!%p115_p9), %v145_v10, %v144_v9  ;;  %v147_v13 = vld [vmem:[%s778_s1 + $0x38] sm:$0xff] (!%p115_p9)  ;;  %v148_v15 = vld [vmem:[%s778_s1 + $0x40] sm:$0xff] (!%p115_p9)  ;;  %v149_v16 = vld [vmem:[%s778_s1 + $0x48] sm:$0xff] (!%p115_p9)  ;;  %v279_v29 = vand.u32 (!%p115_p9), 127, %v278_v28  ;;  %s370_s21 = sshll.u32 (!%p115_p9), %s132_s17, 3  ;;  %s735_s27 = scalar_lea.hbm (!%p115_p9), %s779_s2, %s390_s22 }
  0x11   : > { %449 = vmatprep.subr.bf16.mxu0 (!%p115_p9), %v587_v2  ;;  %v458_v14 = vpack.c.bf16 (!%p115_p9), %v147_v13, %v146_v12  ;;  %v462_v17 = vpack.c.bf16 (!%p115_p9), %v149_v16, %v148_v15  ;;  %v150_v18 = vld [vmem:[%s778_s1 + $0x50] sm:$0xff] (!%p115_p9)  ;;  %v151_v19 = vld [vmem:[%s778_s1 + $0x58] sm:$0xff] (!%p115_p9)  ;;  %v152_v21 = vld [vmem:[%s778_s1 + $0x60] sm:$0xff] (!%p115_p9)  ;;  %s134_s23 = scalar_lea.vmem (!%p115_p9), [#allocation2], %s370_s21  ;;  %s294_s28 = scalar_lea.sflag (!%p115_p9), [#allocation3], %s132_s17 }
  0x12   : > { %v466_v20 = vpack.c.bf16 (!%p115_p9), %v151_v19, %v150_v18  ;;  %v153_v22 = vld [vmem:[%s778_s1 + $0x68] sm:$0xff] (!%p115_p9)  ;;  %v154_v24 = vld [vmem:[%s778_s1 + $0x70] sm:$0xff] (!%p115_p9)  ;;  %v155_v25 = vld [vmem:[%s778_s1 + $0x78] sm:$0xff] (!%p115_p9)  ;;  %vm280_vm3 = vcmp.lt.s32.totalorder (!%p115_p9), %v279_v29, 16  ;;  %s307_s24 = sshll.u32 (!%p115_p9), %s134_s23, 4  ;;  %s737_s24 = int_to_ptr.vmem [resolvable:$true] %s307_s24 }
  0x13   : > { %v470_v23 = vpack.c.bf16 (!%p115_p9), %v153_v22, %v152_v21  ;;  %v474_v26 = vpack.c.bf16 (!%p115_p9), %v155_v25, %v154_v24  ;;  %s523_s29 = scalar_lea.vmem (!%p115_p9), %s737_s24, 128 }
  0x14   : > { %p524_p11 = scmp.ne.s32.totalorder (!%p115_p9), %s737_s24, %s523_s29 }
  0x15   : > { %s136_s6 = scalar_select %p135_p10, %s627_s13, 1 }
  0x16   : > { %p525_p12 = pnand %p524_p11, %p644_p5  ;;  %s590_s13 = smov [#allocation2]  }
  0x17   : > { %s371_s7 = sshll.u32 %s136_s6, 3  ;;  %s527_s30 = sshll.u32 %s590_s13, 4  ;;  %s528_s30 = int_to_ptr.vmem [resolvable:$false] %s527_s30 }
  0x18   : > { %452 = vmatpush3.bf16.xpose.msk.msra.mxu0 %vm662_vm1, %v450_v8  ;;  %s138_s16 = scalar_lea.vmem %s777_s0, %s371_s7  ;;  %p526_p13 = pneg %p525_p12 }
  0x19   : > { %453 = vmatprep.subr.bf16.mxu0 %v587_v2  ;;  %v139_v27 = vld [vmem:[%s138_s16] sm:$0xff]  ;;  %s529_s3 = scalar_lea.vmem %s528_s30, 256  ;;  %p530_p0 = scmp.lt.s32.totalorder %s737_s24, %s528_s30 }
  0x1a   : > { %p531_p1 = scmp.lt.s32.totalorder %s529_s3, %s523_s29 }
  0x1c   : > { %p532_p2 = por %p531_p1, %p530_p0 }
  0x1e   : > { %p533_p3 = pnand %p532_p2, %p526_p13 }
  0x20   : > { %456 = vmatpush3.bf16.xpose.msk.msra.mxu0 %vm662_vm1, %v454_v11 }
  0x21   : > { %457 = vmatprep.subr.bf16.mxu0 %v587_v2 }
  0x28   : > { %460 = vmatpush3.bf16.xpose.msk.msra.mxu0 %vm662_vm1, %v458_v14 }
  0x29   : > { %461 = vmatprep.subr.bf16.mxu0 %v587_v2 }
  0x30   : > { %464 = vmatpush3.bf16.xpose.msk.msra.mxu0 %vm662_vm1, %v462_v17 }
  0x31   : > { %465 = vmatprep.subr.bf16.mxu0 %v587_v2 }
  0x38   : > { %468 = vmatpush3.bf16.xpose.msk.msra.mxu0 %vm662_vm1, %v466_v20 }
  0x39   : > { %469 = vmatprep.subr.bf16.mxu0 %v587_v2 }
  0x40   : > { %472 = vmatpush3.bf16.xpose.msk.msra.mxu0 %vm662_vm1, %v470_v23 }
  0x41   : > { %473 = vmatprep.subr.bf16.mxu0 %v587_v2 }
  0x48   : > { %476 = vmatpush3.bf16.xpose.msk.msra.mxu0 %vm662_vm1, %v474_v26 }
  0x4f   : > { %443 = vmatmul.mubr.msk.f32.vlgmr.msra.gmra.mrb[0].mxu0 %vm156_vm0, %v139_v27 }
 0x122   : > { %v274_v30 = vpop.f32.mrb[0].mxu0 }
 0x123   : > { %v444_v31 = vpop.f32.mrb[1].mxu0  ;;  %v281_v32 = vsel %vm280_vm3, %v274_v30, -inf }
 0x124   : > { %282 = vmax.xlane.f32.xlu0 %v281_v32 }
 0x1b1   : > { %v283_v33 = vpop.xlane.xlu0 %282 }
 0x1b2   : > { %v284_v34 = vsub.f32 %v281_v32, %v283_v33 }
 0x1b4   : > { %v285_v35 = vmul.f32 1.442695, %v284_v34 }
 0x1b6   : > { %519 = vpow2.f32 %v285_v35 }
 0x1c0   : > { %v520_v36 = vpop.eup %519 }
 0x1c1   : > { %287 = vadd.xlane.f32.xlu0 %v520_v36 }
 0x24e   : > { %v288_v37 = vpop.xlane.xlu0 %287 }
 0x24f   : > { %521 = vlog2.f32 %v288_v37 }
 0x259   : > { %v522_v38 = vpop.eup %521 }
 0x25a   : > { %v290_v39 = vmul.f32 0.6931472, %v522_v38 }
 0x25c   : > { %v291_v40 = vsub.f32 %v284_v34, %v290_v39 }
 0x25e   : > { %292 = vst [vmem:[%s134_s23] sm:$0xff] %v291_v40 }
 0x25f   : > { %536 = shalt.err (!%p533_p3)
}
 0x260   : > { %s537_s4 = scalar_lea.hbm %s735_s27, 128  ;;  %s541_s7 = scalar_lea.hbm %s779_s2, 256 }
 0x261   : > { %p538_p4 = scmp.ne.s32.totalorder %s735_s27, %s537_s4  ;;  %p542_p9 = scmp.lt.u32.totalorder %s735_s27, %s779_s2 }
 0x262   : > { %p543_p10 = scmp.lt.u32.totalorder %s541_s7, %s537_s4  ;;  %p545_p12 = scmp.lt.u32.totalorder %s537_s4, %s735_s27 }
 0x263   : > { %p539_p7 = pnand %p538_p4, %p644_p5 }
 0x264   : > { %p544_p11 = por %p543_p10, %p542_p9 }
 0x265   : > { %p540_p8 = pneg %p539_p7 }
 0x266   : > { %p546_p13 = por %p545_p12, %p544_p11 }
 0x268   : > { %p547_p0 = pnand %p546_p13, %p540_p8 }
 0x26a   : > { %550 = shalt.err (!%p547_p0)
}
 0x26b   : > { %477 = dma.vmem_to_hbm [thread:$0]  (%p644_p5), %s737_s24, 128, %s735_s27, %s294_s28  }
 0x26c PF: > { %p483_p1 = scmp.ge.s32.totalorder %s585_s12, 2  ;;  %s319_s16 = sand.u32 1, %s573_s9  }
 0x26d   : > { %s320_s17 = scalar_lea.sflag [#allocation3], %s319_s16 }
 0x26e   : > { %p480_p2 = pnand %p483_p1, %p648_p6 }
 0x270   : > { %568 = dma.done.wait (!%p480_p2), %s320_s17, 128  }
 0x271   : > { %570 = vsyncadd (!%p480_p2), %s320_s17, 4294967168  ;;  %p12_p3 = scmp.ge.s32.totalorder %s631_s15, 4   ;;  %s784_s9 = smov %s577_s10 }
 0x272   : > { %s785_s10 = smov %s581_s11  ;;  %s786_s11 = smov %s642_s18 }
 0x273   : > { %s787_s12 = smov %s631_s15  ;;  %14 = sbr.rel (!%p12_p3) target bundleno = 3 (0x3), region = 63 }
 0x27a   :  { %325 = vsyncpa [#allocation3], 1 }
 0x27b   :  { %327 = vsyncpa [#allocation3 + $0x1], 1 }

</bundles_post_ra>
